<compile_context>
chip_gen: v7x
topology: tpu7x:2x2x1
jax: 0.10.0
libtpu: 0.0.40
codegen_flags: <defaults>
</compile_context>

<pallas_src>
import jax
import jax.numpy as jnp
from jax import lax
from jax.experimental import pallas as pl
from jax.experimental.pallas import tpu as pltpu


def _round_up(n, m):
    return ((n + m - 1) // m) * m


def _orthogonal(key, shape, dtype=jnp.float32):
    """Deterministic orthogonal init matching nn.init.orthogonal_ semantics."""
    rows, cols = shape
    n = max(rows, cols)
    a = jax.random.normal(key, (n, min(rows, cols)), dtype=jnp.float32)
    q, r = jnp.linalg.qr(a)
    sign = jnp.sign(jnp.diag(r))
    sign = jnp.where(sign == 0, 1.0, sign)   # guard against zero diagonal
    q = q * sign[None, :]
    if rows < cols:
        q = q.T
    return q[:rows, :cols].astype(dtype)


def _mlp_kernel(x_ref, w1_ref, b1_ref, w2_ref, b2_ref, w3_ref, b3_ref, o_ref):
    # x_ref : [bt, in_dim]   natural layout tile (streamed)
    # wK_ref: [out, in]      PyTorch layout, resident in VMEM (constant index_map)
    # bK_ref: [out, 1]       broadcasts over batch lanes, f32
    # o_ref : [out_dim, bt]  transposed, lane-dense output
    cd = w1_ref.dtype
    x = x_ref[...]
    # First layer: contract in_dim of w1 [hid,in] with in_dim of x [bt,in] -> [hid, bt].
    # This is w1 @ x^T; the narrow-tile relayout lands on the otherwise-idle XLU.
    h = lax.dot_general(w1_ref[...], x, (((1,), (1,)), ((), ())),
                        preferred_element_type=jnp.float32)
    h = jnp.maximum(h + b1_ref[...], 0.0).astype(cd)
    h = jnp.dot(w2_ref[...], h, preferred_element_type=jnp.float32)
    h = jnp.maximum(h + b2_ref[...], 0.0).astype(cd)
    y = jnp.dot(w3_ref[...], h, preferred_element_type=jnp.float32)
    o_ref[...] = (y + b3_ref[...]).astype(o_ref.dtype)


def mlp_forward(x, params, *, batch_tile_max=8192, min_grid_steps=4,
                compute_dtype=jnp.float32):
    """x: [B, input_dim]. params: dict of w1,b1,w2,b2,w3,b3 (PyTorch [out,in] layout)."""
    w1, b1, w2, b2, w3, b3 = (params["w1"], params["b1"], params["w2"],
                              params["b2"], params["w3"], params["b3"])
    B, in_dim = x.shape
    out_dim = w3.shape[0]
    cd = jnp.dtype(compute_dtype)

    # Batch tile: lane-dense multiple of 128, large enough to amortize the per-grid-step
    # overhead, but capped so large batches keep >= min_grid_steps parallel steps.
    bt = min(batch_tile_max, _round_up(pl.cdiv(B, min_grid_steps), 128))

    x_in = x
    if B < bt:
        # Tiny batch only (< one tile): pad up to a lane-dense tile; cost negligible.
        x_in = jnp.pad(x, ((0, bt - B), (0, 0)))
    Bk = x_in.shape[0]               # >= B; last block may be partial (writes clipped)
    grid = pl.cdiv(Bk, bt)

    if cd != x_in.dtype:
        x_in = x_in.astype(cd)       # bf16 streaming mode halves input HBM bytes
    w1c, w2c, w3c = (w.astype(cd) for w in (w1, w2, w3))
    # Biases as (out, 1) columns: broadcast over batch lanes; keep VPU math in f32.
    b1c, b2c, b3c = (b.reshape(-1, 1).astype(jnp.float32) for b in (b1, b2, b3))

    # Weights / biases: full-array blocks with constant index_map -> stay resident in VMEM.
    resident = lambda a: pl.BlockSpec(a.shape, lambda i: (0,) * a.ndim)

    yT = pl.pallas_call(
        _mlp_kernel,
        out_shape=jax.ShapeDtypeStruct((out_dim, Bk), x.dtype),
        grid=(grid,),
        in_specs=[
            pl.BlockSpec((bt, in_dim), lambda i: (i, 0)),   # x streamed, natural layout
            resident(w1c), resident(b1c),
            resident(w2c), resident(b2c),
            resident(w3c), resident(b3c),
        ],
        out_specs=pl.BlockSpec((out_dim, bt), lambda i: (0, i)),  # lane-dense output
        compiler_params=pltpu.CompilerParams(
            dimension_semantics=("parallel",),
            vmem_limit_bytes=32 << 20,
        ),
    )(x_in, w1c, b1c, w2c, b2c, w3c, b3c)

    # TODO(synk): callers that can consume the transposed [out_dim, B] layout should use
    # yT directly and skip this small wrapper-side transpose of the output.
    return yT[:, :B].T


def init_params(key, input_dim, hidden_dim, output_dim):
    k1, k2, k3 = jax.random.split(key, 3)
    return {
        "w1": _orthogonal(k1, (hidden_dim, input_dim)),
        "b1": jnp.zeros((hidden_dim,), jnp.float32),
        "w2": _orthogonal(k2, (hidden_dim, hidden_dim)),
        "b2": jnp.zeros((hidden_dim,), jnp.float32),
        "w3": _orthogonal(k3, (output_dim, hidden_dim)),
        "b3": jnp.zeros((output_dim,), jnp.float32),
    }


def mlp_reference(x, params):
    hp = jax.lax.Precision.HIGHEST
    h = jnp.maximum(jnp.dot(x, params["w1"].T, precision=hp) + params["b1"], 0.0)
    h = jnp.maximum(jnp.dot(h, params["w2"].T, precision=hp) + params["b2"], 0.0)
    return jnp.dot(h, params["w3"].T, precision=hp) + params["b3"]


if __name__ == "__main__":
    # MLP(input_dim=16, hidden_dim=32, output_dim=8, hidden_depth=2)
    input_dim, hidden_dim, output_dim = 16, 32, 8

    key = jax.random.PRNGKey(0)
    kx, kp, kx2 = jax.random.split(key, 3)
    params = init_params(kp, input_dim, hidden_dim, output_dim)

    # Small-batch path: single lane-dense (padded-to-128) tile.
    batch = 8
    x = jax.random.normal(kx, (batch, input_dim), dtype=jnp.float32)
    out = jax.block_until_ready(mlp_forward(x, params))
    ref = mlp_reference(x, params)
    assert out.shape == (batch, output_dim)
    assert jnp.allclose(out, ref, atol=1e-3, rtol=1e-3), "mismatch vs reference (small batch)"

    # Tiled path: multiple parallel grid steps + partial (clipped) final block.
    batch2 = 260
    x2 = jax.random.normal(kx2, (batch2, input_dim), dtype=jnp.float32)
    out2 = jax.block_until_ready(mlp_forward(x2, params, batch_tile_max=128))
    ref2 = mlp_reference(x2, params)
    assert out2.shape == (batch2, output_dim)
    assert jnp.allclose(out2, ref2, atol=1e-3, rtol=1e-3), "mismatch vs reference (tiled batch)"

    # bf16 streaming dtype (f32 accumulation): HBM-bound large-batch mode.
    out3 = jax.block_until_ready(
        mlp_forward(x2, params, batch_tile_max=128, compute_dtype=jnp.bfloat16))
    assert out3.shape == (batch2, output_dim)
    assert jnp.allclose(out3, ref2, atol=5e-2, rtol=5e-2), "mismatch vs reference (bf16 path)"

    print("KERNEL_OK")
</pallas_src>

<mosaic_0001>
module attributes {stable_mosaic.version = 11 : i64} {
  func.func @_mlp_kernel(%arg0: i32, %arg1: memref<128x16xf32, #tpu.memory_space<vmem>>, %arg2: memref<32x16xf32, #tpu.memory_space<vmem>>, %arg3: memref<32x1xf32, #tpu.memory_space<vmem>>, %arg4: memref<32x32xf32, #tpu.memory_space<vmem>>, %arg5: memref<32x1xf32, #tpu.memory_space<vmem>>, %arg6: memref<8x32xf32, #tpu.memory_space<vmem>>, %arg7: memref<8x1xf32, #tpu.memory_space<vmem>>, %arg8: memref<8x128xf32, #tpu.memory_space<vmem>>) attributes {dimension_semantics = [#tpu.dimension_semantics<parallel>], iteration_bounds = array<i64: 1>, scalar_prefetch = 0 : i64, scratch_operands = 0 : i64, tpu.core_type = #tpu.core_type<tc>, window_params = [{transform_indices = @transform_0, window_bounds = array<i64: 128, 16>}, {pipeline_mode = #tpu.pipeline_mode<synchronous>, transform_indices = @transform_1, window_bounds = array<i64: 32, 16>}, {pipeline_mode = #tpu.pipeline_mode<synchronous>, transform_indices = @transform_2, window_bounds = array<i64: 32, 1>}, {pipeline_mode = #tpu.pipeline_mode<synchronous>, transform_indices = @transform_3, window_bounds = array<i64: 32, 32>}, {pipeline_mode = #tpu.pipeline_mode<synchronous>, transform_indices = @transform_4, window_bounds = array<i64: 32, 1>}, {pipeline_mode = #tpu.pipeline_mode<synchronous>, transform_indices = @transform_5, window_bounds = array<i64: 8, 32>}, {pipeline_mode = #tpu.pipeline_mode<synchronous>, transform_indices = @transform_6, window_bounds = array<i64: 8, 1>}, {transform_indices = @transform_7, window_bounds = array<i64: 8, 128>}]} {
    %c0 = arith.constant 0 : index
    %c0_0 = arith.constant 0 : index
    %0 = vector.load %arg1[%c0, %c0_0] : memref<128x16xf32, #tpu.memory_space<vmem>>, vector<128x16xf32>
    %c0_1 = arith.constant 0 : index
    %c0_2 = arith.constant 0 : index
    %1 = vector.load %arg2[%c0_1, %c0_2] : memref<32x16xf32, #tpu.memory_space<vmem>>, vector<32x16xf32>
    %cst = arith.constant dense<0.000000e+00> : vector<32x128xf32>
    %2 = tpu.matmul %1, %0, %cst {dimension_numbers = #tpu.dot_dimension_numbers<[1], [1], [0], [0], [0, 0, 1, 0], [], []>} : vector<32x16xf32>, vector<128x16xf32>, vector<32x128xf32> -> vector<32x128xf32>
    %c0_3 = arith.constant 0 : index
    %c0_4 = arith.constant 0 : index
    %3 = vector.load %arg3[%c0_3, %c0_4] : memref<32x1xf32, #tpu.memory_space<vmem>>, vector<32x1xf32>
    %4 = vector.broadcast %3 : vector<32x1xf32> to vector<32x128xf32>
    %5 = arith.addf %2, %4 : vector<32x128xf32>
    %cst_5 = arith.constant 0.000000e+00 : f32
    %6 = vector.broadcast %cst_5 : f32 to vector<32x128xf32>
    %7 = arith.maximumf %5, %6 : vector<32x128xf32>
    %c0_6 = arith.constant 0 : index
    %c0_7 = arith.constant 0 : index
    %8 = vector.load %arg4[%c0_6, %c0_7] : memref<32x32xf32, #tpu.memory_space<vmem>>, vector<32x32xf32>
    %cst_8 = arith.constant dense<0.000000e+00> : vector<32x128xf32>
    %9 = tpu.matmul %8, %7, %cst_8 {dimension_numbers = #tpu.dot_dimension_numbers<[1], [0], [0], [1], [0, 0, 1, 1], [], []>} : vector<32x32xf32>, vector<32x128xf32>, vector<32x128xf32> -> vector<32x128xf32>
    %c0_9 = arith.constant 0 : index
    %c0_10 = arith.constant 0 : index
    %10 = vector.load %arg5[%c0_9, %c0_10] : memref<32x1xf32, #tpu.memory_space<vmem>>, vector<32x1xf32>
    %11 = vector.broadcast %10 : vector<32x1xf32> to vector<32x128xf32>
    %12 = arith.addf %9, %11 : vector<32x128xf32>
    %cst_11 = arith.constant 0.000000e+00 : f32
    %13 = vector.broadcast %cst_11 : f32 to vector<32x128xf32>
    %14 = arith.maximumf %12, %13 : vector<32x128xf32>
    %c0_12 = arith.constant 0 : index
    %c0_13 = arith.constant 0 : index
    %15 = vector.load %arg6[%c0_12, %c0_13] : memref<8x32xf32, #tpu.memory_space<vmem>>, vector<8x32xf32>
    %cst_14 = arith.constant dense<0.000000e+00> : vector<8x128xf32>
    %16 = tpu.matmul %15, %14, %cst_14 {dimension_numbers = #tpu.dot_dimension_numbers<[1], [0], [0], [1], [0, 0, 1, 1], [], []>} : vector<8x32xf32>, vector<32x128xf32>, vector<8x128xf32> -> vector<8x128xf32>
    %c0_15 = arith.constant 0 : index
    %c0_16 = arith.constant 0 : index
    %17 = vector.load %arg7[%c0_15, %c0_16] : memref<8x1xf32, #tpu.memory_space<vmem>>, vector<8x1xf32>
    %18 = vector.broadcast %17 : vector<8x1xf32> to vector<8x128xf32>
    %19 = arith.addf %16, %18 : vector<8x128xf32>
    %c0_17 = arith.constant 0 : index
    %c0_18 = arith.constant 0 : index
    %20 = vector.load %arg8[%c0_17, %c0_18] : memref<8x128xf32, #tpu.memory_space<vmem>>, vector<8x128xf32>
    tpu.vector_store %arg8[%c0_17, %c0_18], %19 {strides = array<i32>} : memref<8x128xf32, #tpu.memory_space<vmem>>, vector<8x128xf32>,
    return
  }
  func.func @transform_0(%arg0: i32) -> (i32, i32) {
    %c0_i32 = arith.constant 0 : i32
    %c0_i32_0 = arith.constant 0 : i32
    return %arg0, %c0_i32 : i32, i32
  }
  func.func @transform_1(%arg0: i32) -> (i32, i32) {
    %c0_i32 = arith.constant 0 : i32
    %c0_i32_0 = arith.constant 0 : i32
    %c0_i32_1 = arith.constant 0 : i32
    return %c0_i32, %c0_i32_0 : i32, i32
  }
  func.func @transform_2(%arg0: i32) -> (i32, i32) {
    %c0_i32 = arith.constant 0 : i32
    %c0_i32_0 = arith.constant 0 : i32
    %c0_i32_1 = arith.constant 0 : i32
    return %c0_i32, %c0_i32_0 : i32, i32
  }
  func.func @transform_3(%arg0: i32) -> (i32, i32) {
    %c0_i32 = arith.constant 0 : i32
    %c0_i32_0 = arith.constant 0 : i32
    %c0_i32_1 = arith.constant 0 : i32
    return %c0_i32, %c0_i32_0 : i32, i32
  }
  func.func @transform_4(%arg0: i32) -> (i32, i32) {
    %c0_i32 = arith.constant 0 : i32
    %c0_i32_0 = arith.constant 0 : i32
    %c0_i32_1 = arith.constant 0 : i32
    return %c0_i32, %c0_i32_0 : i32, i32
  }
  func.func @transform_5(%arg0: i32) -> (i32, i32) {
    %c0_i32 = arith.constant 0 : i32
    %c0_i32_0 = arith.constant 0 : i32
    %c0_i32_1 = arith.constant 0 : i32
    return %c0_i32, %c0_i32_0 : i32, i32
  }
  func.func @transform_6(%arg0: i32) -> (i32, i32) {
    %c0_i32 = arith.constant 0 : i32
    %c0_i32_0 = arith.constant 0 : i32
    %c0_i32_1 = arith.constant 0 : i32
    return %c0_i32, %c0_i32_0 : i32, i32
  }
  func.func @transform_7(%arg0: i32) -> (i32, i32) {
    %c0_i32 = arith.constant 0 : i32
    %c0_i32_0 = arith.constant 0 : i32
    return %c0_i32, %arg0 : i32, i32
  }
}

</mosaic_0001>

<bundles_post_ra>
// kernel: tpu_custom_call.1
= control target key start
LH: loop header
LB: loop body
LE: loop exit
PB: predicated region body
PF: predicated region fallthrough
CT: control target
= control target key end

     0   :  { %vm71_vm0 = vcmask 130048   ;;  %v660_v6 = vmov 0   ;;  %s866_s0 = inlined_call_operand.vmem [shape: f32[128,16], index: 0, kind: input, shape index: {}]   ;;  %s867_s1 = inlined_call_operand.vmem [shape: f32[32,16], index: 1, kind: input, shape index: {}]   ;;  %s868_s2 = inlined_call_operand.vmem [shape: f32[32,1], index: 2, kind: input, shape index: {}]   ;;  %s869_s3 = inlined_call_operand.vmem [shape: f32[32,32], index: 3, kind: input, shape index: {}]   ;;  %s870_s4 = inlined_call_operand.vmem [shape: f32[32,1], index: 4, kind: input, shape index: {}]   ;;  %s871_s5 = inlined_call_operand.vmem [shape: f32[8,32], index: 5, kind: input, shape index: {}]   ;;  %s872_s6 = inlined_call_operand.vmem [shape: f32[8,1], index: 6, kind: input, shape index: {}]   ;;  %s873_s7 = inlined_call_operand.hbm [shape: f32[8,128], index: 7, kind: output, shape index: {}]  }
   0x1   :  { %v27_v0 = vld [vmem:[%s866_s0] sm:$0xff]  ;;  %v28_v1 = vld [vmem:[%s866_s0 + $0x8] sm:$0xff]  ;;  %v29_v2 = vld [vmem:[%s866_s0 + $0x10] sm:$0xff]  ;;  %634 = vset.pattern.permute.xlu0 %v660_v6  ;;  %635 = vset.pattern.permute.xlu1 %v660_v6 }
   0x2   :  { %v567_v3 = vpack.c.bf16 %v28_v1, %v27_v0  ;;  %vm716_vm1 = vmpackc.low %vm71_vm0, %vm71_vm0  ;;  %v30_v5 = vld [vmem:[%s866_s0 + $0x18] sm:$0xff]  ;;  %v43_v8 = vld [vmem:[%s867_s1] sm:$0xff] }
   0x3   :  { %v573_v7 = vpack.c.bf16 %v30_v5, %v29_v2  ;;  %v31_v9 = vld [vmem:[%s866_s0 + $0x20] sm:$0xff]  ;;  %v32_v10 = vld [vmem:[%s866_s0 + $0x28] sm:$0xff]  ;;  %536 = vmatprep.mubr.msk.f32.mxu0 %vm71_vm0, %v43_v8  ;;  %v49_v12 = vld [vmem:[%s868_s2 + $0x10] sm:$0xff] }
   0x4   :  { %569 = vmatprep.subr.msk.bf16.mxu0 %vm716_vm1, %v567_v3  ;;  %v47_v11 = vld [vmem:[%s868_s2] sm:$0xff]  ;;  %63 = vperm.xlu1 %635, %v49_v12   ;;  %v579_v13 = vpack.c.bf16 %v32_v10, %v31_v9  ;;  %v48_v14 = vld [vmem:[%s868_s2 + $0x8] sm:$0xff]  ;;  %v50_v15 = vld [vmem:[%s868_s2 + $0x18] sm:$0xff] }
   0x5   :  { %572 = vmatpush3.bf16.xpose.msk.msra.mxu0 %vm716_vm1, %v567_v3  ;;  %53 = vperm.xlu0 %634, %v47_v11  }
   0x6   :  { %575 = vmatprep.subr.msk.bf16.mxu0 %vm716_vm1, %v573_v7 }
   0x7   :  { %12 = vsyncpa [#allocation3], 0  ;;  %v225_v16 = vld [vmem:[%s870_s4] sm:$0xff]  ;;  %v33_v17 = vld [vmem:[%s866_s0 + $0x30] sm:$0xff]  ;;  %vm249_vm2 = vcmask 261120   ;;  %v661_v61 = vmov 0.0|0.0  }
   0x8   :  { %68 = vperm.xlu1 %635, %v50_v15   ;;  %v34_v18 = vld [vmem:[%s866_s0 + $0x38] sm:$0xff]  ;;  %v226_v19 = vld [vmem:[%s870_s4 + $0x8] sm:$0xff]  ;;  %v227_v21 = vld [vmem:[%s870_s4 + $0x10] sm:$0xff]  ;;  %vm662_vm3 = vmmov 0   ;;  %v663_v62 = vmov 0.0   ;;  %s664_s16 = smov [#allocation2]  }
   0x9   :  { %58 = vperm.xlu0 %634, %v48_v14   ;;  %v585_v20 = vpack.c.bf16 %v34_v18, %v33_v17  ;;  %v228_v22 = vld [vmem:[%s870_s4 + $0x18] sm:$0xff]  ;;  %v352_v23 = vld [vmem:[%s872_s6] sm:$0xff]  ;;  %v36_v25 = vld [vmem:[%s866_s0 + $0x48] sm:$0xff]  ;;  %s438_s4 = sshll.u32 %s664_s16, 4  ;;  %s439_s4 = int_to_ptr.vmem [resolvable:$true] %s438_s4 }
   0xa   :  { %v35_v24 = vld [vmem:[%s866_s0 + $0x40] sm:$0xff]  ;;  %v37_v27 = vld [vmem:[%s866_s0 + $0x50] sm:$0xff]  ;;  %v38_v28 = vld [vmem:[%s866_s0 + $0x58] sm:$0xff]  ;;  %s636_s17 = scalar_lea.vmem %s439_s4, 128  ;;  %p641_p1 = scmp.lt.s32.totalorder %s439_s4, %s439_s4 }
   0xb   :  { %v591_v26 = vpack.c.bf16 %v36_v25, %v35_v24  ;;  %v597_v29 = vpack.c.bf16 %v38_v28, %v37_v27  ;;  %v39_v30 = vld [vmem:[%s866_s0 + $0x60] sm:$0xff]  ;;  %v40_v31 = vld [vmem:[%s866_s0 + $0x68] sm:$0xff]  ;;  %v41_v33 = vld [vmem:[%s866_s0 + $0x70] sm:$0xff]  ;;  %p637_p0 = scmp.ne.s32.totalorder %s439_s4, %s636_s17  ;;  %p642_p2 = scmp.lt.s32.totalorder %s636_s17, %s636_s17 }
   0xc   :  { %236 = vperm.xlu1 %635, %v226_v19   ;;  %v603_v32 = vpack.c.bf16 %v40_v31, %v39_v30  ;;  %v42_v34 = vld [vmem:[%s866_s0 + $0x78] sm:$0xff]  ;;  %v44_v36 = vld [vmem:[%s867_s1 + $0x8] sm:$0xff]  ;;  %v45_v37 = vld [vmem:[%s867_s1 + $0x10] sm:$0xff] }
   0xd   :  { %578 = vmatpush3.bf16.xpose.msk.msra.mxu0 %vm716_vm1, %v573_v7  ;;  %231 = vperm.xlu0 %634, %v225_v16   ;;  %v609_v35 = vpack.c.bf16 %v42_v34, %v41_v33  ;;  %v46_v38 = vld [vmem:[%s867_s1 + $0x18] sm:$0xff]  ;;  %v221_v39 = vld [vmem:[%s869_s3] sm:$0xff]  ;;  %v222_v58 = vld [vmem:[%s869_s3 + $0x8] sm:$0xff]  ;;  %p643_p3 = por %p642_p2, %p641_p1 }
   0xe   :  { %581 = vmatprep.subr.msk.bf16.mxu0 %vm716_vm1, %v579_v13  ;;  %550 = vmatprep.mubr.msk.f32.mxu1 %vm249_vm2, %v221_v39  ;;  %v223_v59 = vld [vmem:[%s869_s3 + $0x10] sm:$0xff]  ;;  %v224_v60 = vld [vmem:[%s869_s3 + $0x18] sm:$0xff]  ;;  %v351_v17 = vld [vmem:[%s871_s5] sm:$0xff] }
   0xf   :  { %p644_p4 = pnand %p643_p3, %p637_p0 }
  0x10   :  { %246 = vperm.xlu1 %635, %v228_v22  }
  0x11   :  { %241 = vperm.xlu0 %634, %v227_v21  }
  0x15   :  { %584 = vmatpush3.bf16.xpose.msk.msra.mxu0 %vm716_vm1, %v579_v13  ;;  %355 = vperm.xlu0 %634, %v352_v23  }
  0x16   :  { %587 = vmatprep.subr.msk.bf16.mxu0 %vm716_vm1, %v585_v20 }
  0x1d   :  { %590 = vmatpush3.bf16.xpose.msk.msra.mxu0 %vm716_vm1, %v585_v20 }
  0x1e   :  { %593 = vmatprep.subr.msk.bf16.mxu0 %vm716_vm1, %v591_v26 }
  0x25   :  { %596 = vmatpush3.bf16.xpose.msk.msra.mxu0 %vm716_vm1, %v591_v26 }
  0x26   :  { %599 = vmatprep.subr.msk.bf16.mxu0 %vm716_vm1, %v597_v29 }
  0x2d   :  { %602 = vmatpush3.bf16.xpose.msk.msra.mxu0 %vm716_vm1, %v597_v29 }
  0x2e   :  { %605 = vmatprep.subr.msk.bf16.mxu0 %vm716_vm1, %v603_v32 }
  0x35   :  { %608 = vmatpush3.bf16.xpose.msk.msra.mxu0 %vm716_vm1, %v603_v32 }
  0x36   :  { %611 = vmatprep.subr.msk.bf16.mxu0 %vm716_vm1, %v609_v35 }
  0x3d   :  { %614 = vmatpush3.bf16.xpose.msk.msra.mxu0 %vm716_vm1, %v609_v35 }
  0x44   :  { %537 = vmatmul.mubr.msk.f32.vlgmr.msra.gmra.mrb[0].mxu0 %vm71_vm0, %v44_v36 }
  0x45   :  { %539 = vmatprep.mubr.msk.f32.mxu0 %vm71_vm0, %v45_v37 }
  0x48   :  { %540 = vmatmul.mubr.msk.f32.gmra.mrb[2].mxu0 %vm71_vm0, %v46_v38 }
  0x83   :  { %v64_v41 = vpop.permute.xlu1 %63 }
  0x84   :  { %v54_v40 = vpop.permute.xlu0 %53 }
  0x87   :  { %v69_v48 = vpop.permute.xlu1 %68 }
  0x88   :  { %v59_v42 = vpop.permute.xlu0 %58 }
  0x8b   :  { %v237_v63 = vpop.permute.xlu1 %236 }
  0x8c   :  { %v232_v0 = vpop.permute.xlu0 %231 }
  0x8f   :  { %v247_v6 = vpop.permute.xlu1 %246 }
  0x90   :  { %v242_v9 = vpop.permute.xlu0 %241 }
  0x94   :  { %v356_v18 = vpop.permute.xlu0 %355 }
 0x117   :  { %v538_v43 = vpop.f32.mrb[0].mxu0 }
 0x118   :  { %v204_v44 = vadd.f32 %v538_v43, %v59_v42  ;;  %v198_v45 = vpop.f32.mrb[1].mxu0 }
 0x119   :  { %v199_v46 = vadd.f32 %v198_v45, %v54_v40 }
 0x11a   :  { %v218_v47 = vmax.f32 %v204_v44, 0.0 }
 0x11b   :  { %v217_v49 = vmax.f32 %v199_v46, 0.0  ;;  %v541_v50 = vpop.f32.mrb[2].mxu0 }
 0x11c   :  { %v214_v51 = vadd.f32 %v541_v50, %v69_v48  ;;  %v208_v52 = vpop.f32.mrb[3].mxu0 }
 0x11d   :  { %v209_v53 = vadd.f32 %v208_v52, %v64_v41  ;;  %v615_v54 = vpack.c.bf16 %v218_v47, %v217_v49 }
 0x11e   :  { %v220_v55 = vmax.f32 %v214_v51, 0.0 }
 0x11f   :  { %v219_v56 = vmax.f32 %v209_v53, 0.0  ;;  %616 = vmatprep.subr.bf16.mxu1 %v615_v54 }
 0x120   :  { %618 = vmatpush3.bf16.msra.mxu1 %v615_v54 }
 0x121   :  { %v619_v57 = vpack.c.bf16 %v220_v55, %v219_v56 }
 0x123   :  { %620 = vmatprep.subr.bf16.mxu1 %v619_v57 }
 0x124   :  { %622 = vmatpush3.bf16.msra.mxu1 %v619_v57 }
 0x125   :  { %623 = vmatprep.subr.bf16.mxu1 %v661_v61 }
 0x127   :  { %551 = vmatmul.mubr.msk.f32.vlgmr.msra.gmra.mrb[0].mxu1 %vm249_vm2, %v222_v58 }
 0x128   :  { %553 = vmatprep.mubr.msk.f32.mxu1 %vm249_vm2, %v223_v59 }
 0x12b   :  { %554 = vmatmul.mubr.msk.f32.gmra.mrb[2].mxu1 %vm249_vm2, %v224_v60 }
 0x12c   :  { %564 = vmatprep.mubr.msk.f32.mxu1 %vm662_vm3, %v663_v62 }
 0x1fa   :  { %v552_v1 = vpop.f32.mrb[0].mxu1 }
 0x1fb   :  { %v334_v2 = vadd.f32 %v552_v1, %v237_v63  ;;  %v328_v3 = vpop.f32.mrb[1].mxu1 }
 0x1fc   :  { %v329_v4 = vadd.f32 %v328_v3, %v232_v0 }
 0x1fd   :  { %v348_v5 = vmax.f32 %v334_v2, 0.0 }
 0x1fe   :  { %v347_v7 = vmax.f32 %v329_v4, 0.0  ;;  %v555_v8 = vpop.f32.mrb[2].mxu1 }
 0x1ff   :  { %v344_v10 = vadd.f32 %v555_v8, %v247_v6  ;;  %v338_v11 = vpop.f32.mrb[3].mxu1 }
 0x200   :  { %v624_v12 = vpack.c.bf16 %v348_v5, %v347_v7  ;;  %v339_v13 = vadd.f32 %v338_v11, %v242_v9 }
 0x201   :  { %v350_v14 = vmax.f32 %v344_v10, 0.0 }
 0x202   :  { %v349_v15 = vmax.f32 %v339_v13, 0.0  ;;  %625 = vmatpush3.bf16.msra.mxu1 %v624_v12 }
 0x203   :  { %626 = vmatprep.subr.bf16.mxu1 %v661_v61 }
 0x204   :  { %v627_v16 = vpack.c.bf16 %v350_v14, %v349_v15 }
 0x206   :  { %628 = vmatpush3.bf16.msra.mxu1 %v627_v16 }
 0x209   :  { %565 = vmatmul.mubr.msk.f32.vlgmr.msra.gmra.mrb[4].mxu1 %vm249_vm2, %v351_v17 }
 0x2dc   :  { %v427_v19 = vpop.f32.mrb[4].mxu1 }
 0x2dd   :  { %v428_v20 = vadd.f32 %v427_v19, %v356_v18  ;;  %v566_v21 = vpop.f32.mrb[5].mxu1 }
 0x2df   :  { %431 = vst [vmem:[#allocation2] sm:$0xff] %v428_v20 }
 0x2e0   :  { %647 = shalt.err (!%p644_p4)
}
 0x2e1   :  { %s648_s5 = scalar_lea.hbm %s873_s7, 128 }
 0x2e2   :  { %p649_p5 = scmp.ne.s32.totalorder %s873_s7, %s648_s5  ;;  %p652_p6 = scmp.lt.u32.totalorder %s648_s5, %s873_s7 }
 0x2e4   :  { %p654_p7 = pnand %p652_p6, %p649_p5 }
 0x2e6   :  { %657 = shalt.err (!%p654_p7)
}
 0x2e7   :  { %441 = dma.vmem_to_hbm [thread:$0]  %s439_s4, 128, %s873_s7, [#allocation3]  }
 0x2e8   :  { %658 = dma.done.wait [#allocation3], 128  }
 0x2e9   :  { %659 = vsyncadd [#allocation3], 4294967168 }
 0x2ea   :  { %445 = vsyncpa [#allocation3], 1 }

</bundles_post_ra>
